<compile_context>
chip_gen: v7x
topology: tpu7x:2x2x1
jax: 0.10.0
libtpu: 0.0.40
codegen_flags: <defaults>
</compile_context>

<pallas_src>
import jax
import jax.numpy as jnp
from jax import lax
from jax.experimental import pallas as pl
from jax.experimental.pallas import tpu as pltpu

_LANES = 128


def _make_max_reduce_kernel(kk):
    def kernel(w_ref, o_ref):
        # w_ref: (kk, R_BLK, 128). Unrolled pairwise max over the leading
        # window axis -> pure VPU elementwise work on dense (8,128) vregs,
        # fully hidden under the input DMA.
        acc = w_ref[0]
        for k in range(1, kk):
            acc = jnp.maximum(acc, w_ref[k])
        o_ref[...] = acc
    return kernel


def _pool_output_size(in_size, k, stride, pad, dil, ceil_mode):
    eff_k = dil * (k - 1) + 1
    num = in_size + 2 * pad - eff_k
    if ceil_mode:
        out = -(-num // stride) + 1
        # PyTorch rule: last window may not start entirely inside the padding.
        if (out - 1) * stride >= in_size + pad:
            out -= 1
    else:
        out = num // stride + 1
    return max(out, 0)


def max_pool2d_pallas(x, kernel_size, stride=None, padding=0, dilation=1,
                      ceil_mode=False, *, target_block_bytes=2 * 1024 * 1024):
    kh, kw = (kernel_size, kernel_size) if isinstance(kernel_size, int) else tuple(kernel_size)
    if stride is None:
        sh, sw = kh, kw
    else:
        sh, sw = (stride, stride) if isinstance(stride, int) else tuple(stride)
    ph, pw = (padding, padding) if isinstance(padding, int) else tuple(padding)
    dh, dw = (dilation, dilation) if isinstance(dilation, int) else tuple(dilation)

    n, c, h, w = x.shape
    ho = _pool_output_size(h, kh, sh, ph, dh, ceil_mode)
    wo = _pool_output_size(w, kw, sw, pw, dw, ceil_mode)

    kk = kh * kw
    ell = n * c * ho * wo
    if ell == 0:
        return jnp.zeros((n, c, ho, wo), x.dtype)

    if jnp.issubdtype(x.dtype, jnp.floating):
        neg = jnp.array(-jnp.inf, dtype=x.dtype)
    else:
        neg = jnp.array(jnp.iinfo(x.dtype).min, dtype=x.dtype)

    # Pad H/W with -inf: `padding` on the left, enough on the right to cover
    # padding plus any ceil_mode overhang.  No pad op at all in the common
    # padding=0 / non-ceil case.
    need_h = (kh - 1) * dh + (ho - 1) * sh + 1
    need_w = (kw - 1) * dw + (wo - 1) * sw + 1
    pad_h_right = max(need_h - (h + ph), ph)
    pad_w_right = max(need_w - (w + pw), pw)
    if ph or pw or pad_h_right or pad_w_right:
        xp = jnp.pad(x, ((0, 0), (0, 0), (ph, pad_h_right), (pw, pad_w_right)),
                     constant_values=neg)
    else:
        xp = x

    # Flattened output length rounded up to full 128-lane rows.
    r = pl.cdiv(ell, _LANES)
    ellp = r * _LANES

    # Gather the KH*KW shifted/strided views (layout glue; candidate for XLA
    # input fusion into the pallas_call via allow_input_fusion below).
    # TODO(synk): fully in-kernel window extraction (no slab) would need
    # lane-strided Ref loads; kept on the XLA side for lowering safety.
    slabs = []
    for ih in range(kh):
        for iw in range(kw):
            view = lax.slice(
                xp,
                (0, 0, ih * dh, iw * dw),
                (n, c, ih * dh + (ho - 1) * sh + 1, iw * dw + (wo - 1) * sw + 1),
                (1, 1, sh, sw)).reshape(-1)
            if ellp != ell:
                view = jnp.pad(view, (0, ellp - ell), constant_values=neg)
            slabs.append(view)
    windows = jnp.stack(slabs, axis=0).reshape(kk, r, _LANES)  # (KK, R, 128)

    # Block sizing: ~2 MiB input block (plateau of the HBM roofline curve),
    # double-buffered footprint (kk+1)*R_BLK*128*itemsize*2 stays well inside
    # the scoped-VMEM defaults on v5e/v6e and v7x (64 MiB physical).
    itemsize = jnp.dtype(x.dtype).itemsize
    r_blk = (target_block_bytes // (kk * _LANES * itemsize)) // 32 * 32
    r_blk = max(r_blk, 8)
    if r <= r_blk:
        r_blk = r          # full second-minor dim (always legal)
        grid_r = 1
    else:
        grid_r = pl.cdiv(r, r_blk)   # uneven tail handled by masked boundary blocks

    out2d = pl.pallas_call(
        _make_max_reduce_kernel(kk),
        out_shape=jax.ShapeDtypeStruct((r, _LANES), x.dtype),
        grid=(grid_r,),
        in_specs=[pl.BlockSpec((kk, r_blk, _LANES), lambda i: (0, i, 0))],
        out_specs=pl.BlockSpec((r_blk, _LANES), lambda i: (i, 0)),
        compiler_params=pltpu.CompilerParams(
            dimension_semantics=("parallel",),
            allow_input_fusion=[True]),
    )(windows)

    return out2d.reshape(-1)[:ell].reshape(n, c, ho, wo)


class ConditionalMaxPool2d:
    """Pallas port of the PyTorch ConditionalMaxPool2d (no learnable params)."""

    def __init__(self, kernel_size, stride=None, padding=0, dilation=1, ceil_mode=False):
        self.kernel_size = kernel_size
        self.stride = stride
        self.padding = padding
        self.dilation = dilation
        self.ceil_mode = ceil_mode

    def __call__(self, x):
        height, width = x.shape[2], x.shape[3]
        if height > 4 and width > 4:
            return max_pool2d_pallas(x, self.kernel_size, self.stride,
                                     self.padding, self.dilation, self.ceil_mode)
        # Identity branch (shapes are static, decided at trace time).
        return x


if __name__ == "__main__":
    key = jax.random.PRNGKey(0)
    x = jax.random.normal(key, (2, 4, 16, 16), dtype=jnp.float32)

    mod = ConditionalMaxPool2d(kernel_size=2)  # stride defaults to kernel_size
    out = jax.block_until_ready(mod(x))

    # Reference check (H > 4, W > 4 branch): max_pool2d k=2, s=2, valid padding.
    ref = lax.reduce_window(
        x, -jnp.inf, lax.max,
        window_dimensions=(1, 1, 2, 2),
        window_strides=(1, 1, 2, 2),
        padding="VALID")
    assert out.shape == (2, 4, 8, 8)
    assert jnp.allclose(out, ref)

    # General path: overlapping windows with padding (k=3, s=2, p=1).
    out2 = jax.block_until_ready(
        max_pool2d_pallas(x, kernel_size=3, stride=2, padding=1))
    ref2 = lax.reduce_window(
        x, -jnp.inf, lax.max,
        window_dimensions=(1, 1, 3, 3),
        window_strides=(1, 1, 2, 2),
        padding=[(0, 0), (0, 0), (1, 1), (1, 1)])
    assert out2.shape == ref2.shape
    assert jnp.allclose(out2, ref2)

    # Identity branch (small spatial dims).
    x_small = jax.random.normal(key, (2, 4, 4, 4), dtype=jnp.float32)
    out_small = jax.block_until_ready(mod(x_small))
    assert out_small.shape == x_small.shape
    assert jnp.allclose(out_small, x_small)

    print("KERNEL_OK")
</pallas_src>

<mosaic_0001>
module attributes {stable_mosaic.version = 11 : i64} {
  func.func @kernel(%arg0: i32, %arg1: memref<4x4x128xf32, #tpu.memory_space<vmem>>, %arg2: memref<4x128xf32, #tpu.memory_space<vmem>>) attributes {dimension_semantics = [#tpu.dimension_semantics<parallel>], iteration_bounds = array<i64: 1>, scalar_prefetch = 0 : i64, scratch_operands = 0 : i64, tpu.core_type = #tpu.core_type<tc>, window_params = [{transform_indices = @transform_0, window_bounds = array<i64: 4, 4, 128>}, {transform_indices = @transform_1, window_bounds = array<i64: 4, 128>}]} {
    %c0 = arith.constant 0 : index
    %c0_0 = arith.constant 0 : index
    %c0_1 = arith.constant 0 : index
    %0 = vector.load %arg1[%c0, %c0_0, %c0_1] : memref<4x4x128xf32, #tpu.memory_space<vmem>>, vector<1x4x128xf32>
    %1 = vector.shape_cast %0 : vector<1x4x128xf32> to vector<4x128xf32>
    %c1 = arith.constant 1 : index
    %c0_2 = arith.constant 0 : index
    %c0_3 = arith.constant 0 : index
    %2 = vector.load %arg1[%c1, %c0_2, %c0_3] : memref<4x4x128xf32, #tpu.memory_space<vmem>>, vector<1x4x128xf32>
    %3 = vector.shape_cast %2 : vector<1x4x128xf32> to vector<4x128xf32>
    %4 = arith.maximumf %1, %3 : vector<4x128xf32>
    %c2 = arith.constant 2 : index
    %c0_4 = arith.constant 0 : index
    %c0_5 = arith.constant 0 : index
    %5 = vector.load %arg1[%c2, %c0_4, %c0_5] : memref<4x4x128xf32, #tpu.memory_space<vmem>>, vector<1x4x128xf32>
    %6 = vector.shape_cast %5 : vector<1x4x128xf32> to vector<4x128xf32>
    %7 = arith.maximumf %4, %6 : vector<4x128xf32>
    %c3 = arith.constant 3 : index
    %c0_6 = arith.constant 0 : index
    %c0_7 = arith.constant 0 : index
    %8 = vector.load %arg1[%c3, %c0_6, %c0_7] : memref<4x4x128xf32, #tpu.memory_space<vmem>>, vector<1x4x128xf32>
    %9 = vector.shape_cast %8 : vector<1x4x128xf32> to vector<4x128xf32>
    %10 = arith.maximumf %7, %9 : vector<4x128xf32>
    %c0_8 = arith.constant 0 : index
    %c0_9 = arith.constant 0 : index
    %11 = vector.load %arg2[%c0_8, %c0_9] : memref<4x128xf32, #tpu.memory_space<vmem>>, vector<4x128xf32>
    tpu.vector_store %arg2[%c0_8, %c0_9], %10 {strides = array<i32>} : memref<4x128xf32, #tpu.memory_space<vmem>>, vector<4x128xf32>,
    return
  }
  func.func @transform_0(%arg0: i32) -> (i32, i32, i32) {
    %c0_i32 = arith.constant 0 : i32
    %c0_i32_0 = arith.constant 0 : i32
    %c0_i32_1 = arith.constant 0 : i32
    return %c0_i32, %arg0, %c0_i32_0 : i32, i32, i32
  }
  func.func @transform_1(%arg0: i32) -> (i32, i32) {
    %c0_i32 = arith.constant 0 : i32
    %c0_i32_0 = arith.constant 0 : i32
    return %arg0, %c0_i32 : i32, i32
  }
}

</mosaic_0001>

<bundles_post_ra>
// kernel: tpu_custom_call.1
= control target key start
LH: loop header
LB: loop body
LE: loop exit
PB: predicated region body
PF: predicated region fallthrough
CT: control target
= control target key end

     0   :  { %6 = vsyncpa [#allocation3], 0  ;;  %s139_s0 = inlined_call_operand.hbm [shape: f32[4,4,128], index: 0, kind: input, shape index: {}]   ;;  %s140_s1 = inlined_call_operand.hbm [shape: f32[4,128], index: 1, kind: output, shape index: {}]  }
   0x1   :  { %7 = vsyncpa [#allocation4], 0  ;;  %s101_s6 = smov [#allocation2]   ;;  %s53_s10 = scalar_lea.hbm %s139_s0, 256 }
   0x2   :  { %s13_s7 = sshll.u32 %s101_s6, 4  ;;  %p54_p0 = scmp.ne.s32.totalorder %s139_s0, %s53_s10  ;;  %s14_s7 = int_to_ptr.vmem [resolvable:$true] %s13_s7 }
   0x3   :  { %p57_p1 = scmp.lt.u32.totalorder %s53_s10, %s139_s0 }
   0x5   :  { %p59_p2 = pnand %p57_p1, %p54_p0 }
   0x7   :  { %62 = shalt.err (!%p59_p2)
}
   0x8   :  { %s63_s15 = scalar_lea.vmem %s14_s7, 256  ;;  %p68_p4 = scmp.lt.s32.totalorder %s14_s7, %s14_s7 }
   0x9   :  { %p64_p3 = scmp.ne.s32.totalorder %s14_s7, %s63_s15  ;;  %p69_p5 = scmp.lt.s32.totalorder %s63_s15, %s63_s15 }
   0xb   :  { %p70_p6 = por %p69_p5, %p68_p4 }
   0xd   :  { %p71_p7 = pnand %p70_p6, %p64_p3 }
   0xf   :  { %74 = shalt.err (!%p71_p7)
}
  0x10   :  { %s102_s16 = smov 64   ;;  %s103_s17 = smov 4  }
  0x11   :  { %19 = dma.hbm_to_vmem [thread:$0]  %s139_s0, 256, %s14_s7, [#allocation3], %s102_s16, %s102_s16, %s103_s17  }
  0x12   :  { %97 = dma.done.wait [#allocation3], 256  }
  0x13   :  { %98 = vsyncadd [#allocation3], 4294967040  ;;  %v23_v0 = vld [vmem:[#allocation2] sm:$0xf]  ;;  %v25_v1 = vld [vmem:[#allocation2 + $0x4] sm:$0xf] }
  0x14   :  { %v28_v2 = vld [vmem:[#allocation2 + $0x8] sm:$0xf]  ;;  %v26_v3 = vmax.f32 %v23_v0, %v25_v1  ;;  %v31_v4 = vld [vmem:[#allocation2 + $0xc] sm:$0xf]  ;;  %s104_s20 = smov [#allocation5]  }
  0x15   :  { %s40_s21 = sshll.u32 %s104_s20, 4  ;;  %s41_s21 = int_to_ptr.vmem [resolvable:$true] %s40_s21 }
  0x16   :  { %v29_v5 = vmax.f32 %v26_v3, %v28_v2  ;;  %s75_s22 = scalar_lea.vmem %s41_s21, 64  ;;  %p80_p9 = scmp.lt.s32.totalorder %s41_s21, %s41_s21 }
  0x17   :  { %p76_p8 = scmp.ne.s32.totalorder %s41_s21, %s75_s22  ;;  %p81_p10 = scmp.lt.s32.totalorder %s75_s22, %s75_s22 }
  0x18   :  { %v32_v6 = vmax.f32 %v29_v5, %v31_v4 }
  0x19   :  { %p82_p11 = por %p81_p10, %p80_p9 }
  0x1a   :  { %33 = vst [vmem:[#allocation5] sm:$0xf] %v32_v6 }
  0x1b   :  { %p83_p12 = pnand %p82_p11, %p76_p8 }
  0x1d   :  { %86 = shalt.err (!%p83_p12)
}
  0x1e   :  { %s87_s24 = scalar_lea.hbm %s140_s1, 64 }
  0x1f   :  { %p88_p13 = scmp.ne.s32.totalorder %s140_s1, %s87_s24  ;;  %p91_p0 = scmp.lt.u32.totalorder %s87_s24, %s140_s1 }
  0x21   :  { %p93_p1 = pnand %p91_p0, %p88_p13 }
  0x23   :  { %96 = shalt.err (!%p93_p1)
}
  0x24   :  { %43 = dma.vmem_to_hbm [thread:$0]  %s41_s21, 64, %s140_s1, [#allocation4]  }
  0x25   :  { %99 = dma.done.wait [#allocation4], 64  }
  0x26   :  { %100 = vsyncadd [#allocation4], 4294967232 }
  0x27   :  { %47 = vsyncpa [#allocation3], 1 }
  0x28   :  { %48 = vsyncpa [#allocation4], 1 }

</bundles_post_ra>
